<compile_context>
chip_gen: v7x
topology: tpu7x:2x2x1
jax: 0.10.0
libtpu: 0.0.40
codegen_flags: <defaults>
</compile_context>

<pallas_src>
import jax
import jax.numpy as jnp
from jax.experimental import pallas as pl
from jax.experimental.pallas import tpu as pltpu

H_PAD = 128        # hidden width padded to a full 128-lane vreg / MXU tile
OUT_PAD = 128      # padded output width used for the last matmul (MXU dense)
MAX_BATCH_TILE = 1024


def _round_up(x, m):
    return ((x + m - 1) // m) * m


def _choose_batch_tile(batch, max_tile=MAX_BATCH_TILE):
    """Pick the batch tile.

    - <=128 rows: single tile (splitting buys nothing, call is launch-bound).
    - otherwise: ~half the batch so the grid has >= 2 "parallel" steps (v7x:
      both TensorCores run), clamped to [128, max_tile]. Even at bt=1024 the
      double-buffered x/out tiles plus ~135 KB of resident weights are ~1.2 MB,
      far under every generation's VMEM budget (incl. v7x's 64 MiB).
    """
    padded = _round_up(batch, 8)
    if padded <= 128:
        return padded
    half = _round_up(pl.cdiv(padded, 2), 8)
    return min(max_tile, max(128, half))


def _pick_param_dtype():
    """bf16 weights on chips with native bf16 VPU/MXU (v6e/v7x); f32 elsewhere.

    v7x note: its MXU has no int8 path (fp8 only), so an int8-quantized weight
    variant built for v5e/v6e must NOT be ported as-is; bf16 is the safe cast.
    """
    try:
        kind = jax.devices()[0].device_kind.lower()
    except Exception:
        return jnp.float32
    if "v6" in kind or "v7" in kind:
        return jnp.bfloat16
    return jnp.float32  # v5e: no bf16 VALU -> keep f32 epilogue/operands


def mlp_kernel(x_ref, w1_ref, w2_ref, w3_ref, b_ref, o_ref):
    # One batch tile per grid step; all three matmuls + ReLUs fused.
    # Matmul operands use the weight dtype (f32 or bf16); accumulation and the
    # bias/ReLU epilogue stay f32 (exact when weights are f32, bounded error
    # when bf16).
    cdt = w1_ref.dtype
    x = x_ref[...].astype(cdt)
    b1 = b_ref[0:1, :]          # static slices of the packed f32 bias slab
    b2 = b_ref[1:2, :]
    b3 = b_ref[2:3, :]
    h1 = jnp.dot(x, w1_ref[...], preferred_element_type=jnp.float32) + b1
    h1 = jnp.maximum(h1, 0.0)
    h2 = jnp.dot(h1.astype(cdt), w2_ref[...], preferred_element_type=jnp.float32) + b2
    h2 = jnp.maximum(h2, 0.0)
    out = jnp.dot(h2.astype(cdt), w3_ref[...], preferred_element_type=jnp.float32) + b3
    # Store only the real output columns (masked vst, but 32x fewer HBM bytes
    # than writing the 128-lane padded slab and slicing it in a second pass).
    o_ref[...] = out[:, : o_ref.shape[1]].astype(o_ref.dtype)


def neural_network_forward(x, params, output_size, *, max_batch_tile=MAX_BATCH_TILE):
    """x: (batch, input_size) f32. params: padded {'w1','w2','w3','b'}.

    Returns (batch, output_size) f32, matching the PyTorch forward.
    """
    w1, w2, w3, b = params["w1"], params["w2"], params["w3"], params["b"]
    batch, in_size = x.shape

    bt = _choose_batch_tile(batch, max_batch_tile)
    grid = (pl.cdiv(batch, bt),)

    eff_batch = grid[0] * bt
    flops = 2 * eff_batch * (in_size * H_PAD + H_PAD * H_PAD + H_PAD * OUT_PAD)
    bytes_accessed = (
        x.size * x.dtype.itemsize
        + w1.size * w1.dtype.itemsize
        + w2.size * w2.dtype.itemsize
        + w3.size * w3.dtype.itemsize
        + b.size * b.dtype.itemsize
        + batch * output_size * 4
    )

    # Weights/biases: full-array blocks with constant index_map -> DMA'd once,
    # VMEM-resident across the batch grid. Activations: tiled over batch;
    # Pallas handles the trailing partial block (no wrapper-side padding).
    const = lambda a: pl.BlockSpec(a.shape, lambda i: (0,) * a.ndim)

    return pl.pallas_call(
        mlp_kernel,
        out_shape=jax.ShapeDtypeStruct((batch, output_size), jnp.float32),
        grid_spec=pltpu.PrefetchScalarGridSpec(
            num_scalar_prefetch=0,
            grid=grid,
            in_specs=[
                pl.BlockSpec((bt, in_size), lambda i: (i, 0)),   # x batch tile
                const(w1),
                const(w2),
                const(w3),
                const(b),
            ],
            out_specs=pl.BlockSpec((bt, output_size), lambda i: (i, 0)),
        ),
        compiler_params=pltpu.CompilerParams(
            dimension_semantics=("parallel",),
        ),
        cost_estimate=pl.CostEstimate(
            flops=flops, transcendentals=0, bytes_accessed=bytes_accessed
        ),
    )(x, w1, w2, w3, b)


def init_params(key, input_size, hidden_size, output_size, *, dtype=jnp.float32):
    """PyTorch nn.Linear-style init: U(-1/sqrt(fan_in), 1/sqrt(fan_in)),
    stored transposed as (in, out), zero-padded to TPU-friendly widths, and
    cast to `dtype` (weights only; biases stay f32 for the f32 epilogue)."""
    def linear(k, fan_in, fan_out):
        kw, kb = jax.random.split(k)
        bound = 1.0 / jnp.sqrt(jnp.float32(fan_in))
        w = jax.random.uniform(kw, (fan_in, fan_out), jnp.float32, -bound, bound)
        b = jax.random.uniform(kb, (fan_out,), jnp.float32, -bound, bound)
        return w, b

    k1, k2, k3 = jax.random.split(key, 3)
    w1, b1 = linear(k1, input_size, hidden_size)
    w2, b2 = linear(k2, hidden_size, hidden_size)
    w3, b3 = linear(k3, hidden_size, output_size)

    # Zero padding is exact: padded hidden units get 0 pre-activation
    # (ReLU -> 0) and contribute 0 downstream; padded output columns are never
    # stored (the kernel writes only the first output_size lanes).
    w1p = jnp.zeros((input_size, H_PAD), dtype).at[:, :hidden_size].set(w1.astype(dtype))
    w2p = jnp.zeros((H_PAD, H_PAD), dtype).at[:hidden_size, :hidden_size].set(w2.astype(dtype))
    w3p = jnp.zeros((H_PAD, OUT_PAD), dtype).at[:hidden_size, :output_size].set(w3.astype(dtype))

    # Pack all biases into a single f32 (8, 128) slab: rows 0/1/2 = b1/b2/b3.
    bpack = jnp.zeros((8, max(H_PAD, OUT_PAD)), jnp.float32)
    bpack = bpack.at[0, :hidden_size].set(b1)
    bpack = bpack.at[1, :hidden_size].set(b2)
    bpack = bpack.at[2, :output_size].set(b3)

    return {"w1": w1p, "w2": w2p, "w3": w3p, "b": bpack}


def reference_forward(x, p, output_size):
    # Pure-JAX f32 reference over the same (possibly bf16-rounded) parameters.
    w1 = p["w1"].astype(jnp.float32)
    w2 = p["w2"].astype(jnp.float32)
    w3 = p["w3"].astype(jnp.float32)
    b = p["b"]
    h1 = jnp.maximum(x @ w1 + b[0:1, :], 0.0)
    h2 = jnp.maximum(h1 @ w2 + b[1:2, :], 0.0)
    out = h2 @ w3 + b[2:3, :]
    return out[:, :output_size]


if __name__ == "__main__":
    # LunarLander-v2 sizes: state dim 8, 4 actions, hidden 64. Batch 200 is a
    # replay-batch-sized input that is NOT a tile multiple, exercising the
    # cdiv grid / partial trailing block path and a 2-step parallel grid.
    input_size, hidden_size, output_size = 8, 64, 4
    batch = 200

    param_dtype = _pick_param_dtype()

    key = jax.random.PRNGKey(0)
    kx, kp = jax.random.split(key)
    x = jax.random.normal(kx, (batch, input_size), dtype=jnp.float32)
    params = init_params(kp, input_size, hidden_size, output_size, dtype=param_dtype)

    out = neural_network_forward(x, params, output_size)
    out = jax.block_until_ready(out)

    ref = reference_forward(x, params, output_size)
    assert out.shape == (batch, output_size)
    tol = 1e-5 if param_dtype == jnp.float32 else 5e-2  # bf16 matmul operands
    assert jnp.allclose(out, ref, atol=tol, rtol=tol), (
        "max abs err = %f" % float(jnp.max(jnp.abs(out - ref)))
    )

    print("KERNEL_OK")
</pallas_src>

<mosaic_0001>
module attributes {stable_mosaic.version = 11 : i64} {
  func.func @mlp_kernel(%arg0: i32, %arg1: memref<128x8xf32, #tpu.memory_space<vmem>>, %arg2: memref<8x128xf32, #tpu.memory_space<vmem>>, %arg3: memref<128x128xf32, #tpu.memory_space<vmem>>, %arg4: memref<128x128xf32, #tpu.memory_space<vmem>>, %arg5: memref<8x128xf32, #tpu.memory_space<vmem>>, %arg6: memref<128x4xf32, #tpu.memory_space<vmem>>) attributes {dimension_semantics = [#tpu.dimension_semantics<parallel>], iteration_bounds = array<i64: 2>, scalar_prefetch = 0 : i64, scratch_operands = 0 : i64, tpu.core_type = #tpu.core_type<tc>, window_params = [{transform_indices = @transform_0, window_bounds = array<i64: 128, 8>}, {pipeline_mode = #tpu.pipeline_mode<synchronous>, transform_indices = @transform_1, window_bounds = array<i64: 8, 128>}, {pipeline_mode = #tpu.pipeline_mode<synchronous>, transform_indices = @transform_2, window_bounds = array<i64: 128, 128>}, {pipeline_mode = #tpu.pipeline_mode<synchronous>, transform_indices = @transform_3, window_bounds = array<i64: 128, 128>}, {pipeline_mode = #tpu.pipeline_mode<synchronous>, transform_indices = @transform_4, window_bounds = array<i64: 8, 128>}, {transform_indices = @transform_5, window_bounds = array<i64: 128, 4>}]} {
    %c0 = arith.constant 0 : index
    %c0_0 = arith.constant 0 : index
    %0 = vector.load %arg1[%c0, %c0_0] : memref<128x8xf32, #tpu.memory_space<vmem>>, vector<128x8xf32>
    %c0_1 = arith.constant 0 : index
    %c0_2 = arith.constant 0 : index
    %1 = vector.load %arg5[%c0_1, %c0_2] : memref<8x128xf32, #tpu.memory_space<vmem>>, vector<1x128xf32>
    %c1 = arith.constant 1 : index
    %c0_3 = arith.constant 0 : index
    %2 = vector.load %arg5[%c1, %c0_3] : memref<8x128xf32, #tpu.memory_space<vmem>>, vector<1x128xf32>
    %c2 = arith.constant 2 : index
    %c0_4 = arith.constant 0 : index
    %3 = vector.load %arg5[%c2, %c0_4] : memref<8x128xf32, #tpu.memory_space<vmem>>, vector<1x128xf32>
    %c0_5 = arith.constant 0 : index
    %c0_6 = arith.constant 0 : index
    %4 = vector.load %arg2[%c0_5, %c0_6] : memref<8x128xf32, #tpu.memory_space<vmem>>, vector<8x128xf32>
    %cst = arith.constant dense<0.000000e+00> : vector<128x128xf32>
    %5 = tpu.matmul %0, %4, %cst {dimension_numbers = #tpu.dot_dimension_numbers<[1], [0], [0], [1], [0, 0, 1, 1], [], []>} : vector<128x8xf32>, vector<8x128xf32>, vector<128x128xf32> -> vector<128x128xf32>
    %6 = vector.broadcast %1 : vector<1x128xf32> to vector<128x128xf32>
    %7 = arith.addf %5, %6 : vector<128x128xf32>
    %cst_7 = arith.constant 0.000000e+00 : f32
    %8 = vector.broadcast %cst_7 : f32 to vector<128x128xf32>
    %9 = arith.maximumf %7, %8 : vector<128x128xf32>
    %c0_8 = arith.constant 0 : index
    %c0_9 = arith.constant 0 : index
    %10 = vector.load %arg3[%c0_8, %c0_9] : memref<128x128xf32, #tpu.memory_space<vmem>>, vector<128x128xf32>
    %cst_10 = arith.constant dense<0.000000e+00> : vector<128x128xf32>
    %11 = tpu.matmul %9, %10, %cst_10 {dimension_numbers = #tpu.dot_dimension_numbers<[1], [0], [0], [1], [0, 0, 1, 1], [], []>} : vector<128x128xf32>, vector<128x128xf32>, vector<128x128xf32> -> vector<128x128xf32>
    %12 = vector.broadcast %2 : vector<1x128xf32> to vector<128x128xf32>
    %13 = arith.addf %11, %12 : vector<128x128xf32>
    %cst_11 = arith.constant 0.000000e+00 : f32
    %14 = vector.broadcast %cst_11 : f32 to vector<128x128xf32>
    %15 = arith.maximumf %13, %14 : vector<128x128xf32>
    %c0_12 = arith.constant 0 : index
    %c0_13 = arith.constant 0 : index
    %16 = vector.load %arg4[%c0_12, %c0_13] : memref<128x128xf32, #tpu.memory_space<vmem>>, vector<128x128xf32>
    %cst_14 = arith.constant dense<0.000000e+00> : vector<128x128xf32>
    %17 = tpu.matmul %15, %16, %cst_14 {dimension_numbers = #tpu.dot_dimension_numbers<[1], [0], [0], [1], [0, 0, 1, 1], [], []>} : vector<128x128xf32>, vector<128x128xf32>, vector<128x128xf32> -> vector<128x128xf32>
    %18 = vector.broadcast %3 : vector<1x128xf32> to vector<128x128xf32>
    %19 = arith.addf %17, %18 : vector<128x128xf32>
    %20 = vector.extract_strided_slice %19 {offsets = [0, 0], sizes = [128, 4], strides = [1, 1]} : vector<128x128xf32> to vector<128x4xf32>
    %c0_15 = arith.constant 0 : index
    %c0_16 = arith.constant 0 : index
    %21 = vector.load %arg6[%c0_15, %c0_16] : memref<128x4xf32, #tpu.memory_space<vmem>>, vector<128x4xf32>
    tpu.vector_store %arg6[%c0_15, %c0_16], %20 {strides = array<i32>} : memref<128x4xf32, #tpu.memory_space<vmem>>, vector<128x4xf32>,
    return
  }
  func.func @transform_0(%arg0: i32) -> (i32, i32) {
    %c0_i32 = arith.constant 0 : i32
    %c0_i32_0 = arith.constant 0 : i32
    return %arg0, %c0_i32 : i32, i32
  }
  func.func @transform_1(%arg0: i32) -> (i32, i32) {
    %c0_i32 = arith.constant 0 : i32
    %c0_i32_0 = arith.constant 0 : i32
    %c0_i32_1 = arith.constant 0 : i32
    return %c0_i32, %c0_i32_0 : i32, i32
  }
  func.func @transform_2(%arg0: i32) -> (i32, i32) {
    %c0_i32 = arith.constant 0 : i32
    %c0_i32_0 = arith.constant 0 : i32
    %c0_i32_1 = arith.constant 0 : i32
    return %c0_i32, %c0_i32_0 : i32, i32
  }
  func.func @transform_3(%arg0: i32) -> (i32, i32) {
    %c0_i32 = arith.constant 0 : i32
    %c0_i32_0 = arith.constant 0 : i32
    %c0_i32_1 = arith.constant 0 : i32
    return %c0_i32, %c0_i32_0 : i32, i32
  }
  func.func @transform_4(%arg0: i32) -> (i32, i32) {
    %c0_i32 = arith.constant 0 : i32
    %c0_i32_0 = arith.constant 0 : i32
    %c0_i32_1 = arith.constant 0 : i32
    return %c0_i32, %c0_i32_0 : i32, i32
  }
  func.func @transform_5(%arg0: i32) -> (i32, i32) {
    %c0_i32 = arith.constant 0 : i32
    %c0_i32_0 = arith.constant 0 : i32
    return %arg0, %c0_i32 : i32, i32
  }
}

</mosaic_0001>

<bundles_post_ra>
// kernel: tpu_custom_call.1
= control target key start
LH: loop header
LB: loop body
LE: loop exit
PB: predicated region body
PF: predicated region fallthrough
CT: control target
= control target key end

     0   :  { %10 = vsyncpa [#allocation3], 0  ;;  %s1730_s18 = smov 0   ;;  %s1732_s19 = smov 0   ;;  %s2031_s0 = inlined_call_operand.vmem [shape: f32[200,8], index: 0, kind: input, shape index: {}]   ;;  %s2032_s1 = inlined_call_operand.vmem [shape: f32[8,128], index: 1, kind: input, shape index: {}]   ;;  %s2033_s2 = inlined_call_operand.vmem [shape: f32[128,128], index: 2, kind: input, shape index: {}]   ;;  %s2034_s3 = inlined_call_operand.hbm [shape: f32[128,128], index: 3, kind: input, shape index: {}]   ;;  %s2035_s4 = inlined_call_operand.vmem [shape: f32[8,128], index: 4, kind: input, shape index: {}]   ;;  %s2036_s5 = inlined_call_operand.vmem [shape: f32[200,4], index: 5, kind: output, shape index: {}]  }
   0x1   :  { %s1734_s20 = smov 0  }
   0x2 LB: > { %s1743_s21 = sadd.s32 4294967295, %s1663_s20   ;;  %s1745_s22 = sadd.s32 1, %s1663_s20   ;;  %s1663_s20 = sphi %s1734_s20, %s2051_s20   ;;  %s1659_s19 = sphi %s1732_s19, %s2050_s19   ;;  %s1655_s18 = sphi %s1730_s18, %s2049_s18  }
   0x3   : > { %s130_s23 = ssub.s32 %s1663_s20, %s1745_s22  ;;  %s133_s24 = sadd.s32 1, %s1659_s19 }
   0x4   : > { %p131_p0 = scmp.eq.s32.totalorder %s130_s23, 0  ;;  %p143_p1 = scmp.ne.s32.totalorder %s1659_s19, %s1655_s18 }
   0x5   : > { %p144_p2 = scmp.eq.s32.totalorder %s1743_s21, 1  ;;  %p1146_p3 = scmp.ge.s32.totalorder %s1663_s20, 1 }
   0x6   : > { %s1753_s25 = scalar_select %p131_p0, %s1659_s19, %s133_s24  }
   0x7   : > { %p1755_p4 = por %p144_p2, %p143_p1  ;;  %p157_p5 = scmp.lt.s32.totalorder %s1663_s20, 3 }
   0x8   : > { %p2037_p6 = scmp.eq.s32.totalorder %s1743_s21, 0  ;;  %s1697_s28 = smov [#allocation2]  }
   0x9   : > { %s2039_s26 = scalar_select %p1755_p4, 1, 0 }
   0xa   : > { %p1760_p7 = pnand %p1146_p3, %p157_p5  ;;  %s175_s29 = sshll.u32 %s1697_s28, 4  ;;  %s176_s29 = int_to_ptr.vmem [resolvable:$true] %s175_s29 }
   0xb   : > { %s1577_s8 = scalar_lea.hbm %s2034_s3, 2048 }
   0xc   : > { %s2040_s27 = scalar_select %p1760_p7, 1, 0 }
   0xd   : > { %p1480_p8 = pneg %p1760_p7  ;;  %p1578_p10 = scmp.ne.s32.totalorder %s2034_s3, %s1577_s8 }
   0xe   : > { %p1584_p0 = scmp.lt.u32.totalorder %s1577_s8, %s2034_s3 }
   0xf   : > { %p1768_p9 = pnand %p2037_p6, %p1480_p8 }
  0x11   : > { %p1579_p11 = pneg %p1768_p9 }
  0x13   : > { %p1580_p12 = pnand %p1579_p11, %p1578_p10 }
  0x15   : > { %p1581_p13 = pneg %p1580_p12 }
  0x17   : > { %p1586_p1 = pnand %p1584_p0, %p1581_p13 }
  0x19   : > { %1589 = shalt.err (!%p1586_p1)
}
  0x1a   : > { %s1590_s13 = scalar_lea.vmem %s176_s29, 2048  ;;  %p1598_p8 = scmp.lt.s32.totalorder %s176_s29, %s176_s29 }
  0x1b   : > { %p1591_p2 = scmp.ne.s32.totalorder %s176_s29, %s1590_s13  ;;  %p1599_p6 = scmp.lt.s32.totalorder %s1590_s13, %s1590_s13 }
  0x1d   : > { %p1593_p3 = pnand %p1591_p2, %p1579_p11  ;;  %p1600_p4 = por %p1599_p6, %p1598_p8 }
  0x1f   : > { %p1594_p5 = pneg %p1593_p3 }
  0x21   : > { %p1601_p7 = pnand %p1600_p4, %p1594_p5 }
  0x23   : > { %1604 = shalt.err (!%p1601_p7)
}
  0x24   : > { %s1698_s14 = smov 128   ;;  %s1699_s15 = smov 8  }
  0x25   : > { %1483 = dma.hbm_to_vmem [thread:$0]  (!%p1768_p9), %s2034_s3, 2048, %s176_s29, [#allocation3], %s1698_s14, %s1698_s14, %s1699_s15  }
  0x26   : > { %p2042_p10 = scmp.ne.s32.totalorder %s2040_s27, 0 }
  0x27   : > { %p2043_p12 = scmp.eq.s32.totalorder (!%p2042_p10), %s1743_s21, 0 }
  0x28   : > { %211 = sbr.rel (%p2042_p10) target bundleno = 786 (0x312), region = 40 }
  0x2f   : > { %1650 = dma.done.wait (%p2043_p12), [#allocation3], 2048   ;;  %p2044_p11 = pmov %p2043_p12 }
  0x30   : > { %s1795_s20 = sshll.u32 %s1743_s21, 4  ;;  %vm285_vm0 = vcmask 64512   ;;  %v280_v0 = vld [vmem:[%s2032_s1] sm:$0xff]  ;;  %v496_v7 = vld [vmem:[%s2033_s2 + $0x8] sm:$0xff]  ;;  %v497_v8 = vld [vmem:[%s2033_s2 + $0x10] sm:$0xff]  ;;  %s239_s8 = sand.u32 1, %s1655_s18  }
  0x31   : > { %1652 = vsyncadd (%p2044_p11), [#allocation3], 4294965248  ;;  %p247_p4 = scmp.lt.s32.totalorder %s1795_s20, 24  ;;  %1274 = vmatprep.subr.mxu0 %v280_v0  ;;  %v495_v6 = vld [vmem:[%s2033_s2] sm:$0xff]  ;;  %v498_v9 = vld [vmem:[%s2033_s2 + $0x18] sm:$0xff]  ;;  %s1151_s9 = sshll.u32 %s239_s8, 7 }
  0x32   : > { %1275 = vmatpush3.msra.mxu0 %v280_v0  ;;  %v1412_v10 = vpack.c.bf16 %v496_v7, %v495_v6  ;;  %v1416_v11 = vpack.c.bf16 %v498_v9, %v497_v8  ;;  %v499_v13 = vld [vmem:[%s2033_s2 + $0x20] sm:$0xff]  ;;  %v500_v14 = vld [vmem:[%s2033_s2 + $0x28] sm:$0xff]  ;;  %v501_v18 = vld [vmem:[%s2033_s2 + $0x30] sm:$0xff]  ;;  %vm841_vm1 = vcmask 31744   ;;  %s1897_s12 = scalar_lea.vmem [#allocation4], %s1151_s9   ;;  %p2045_p6 = scmp.ne.s32.totalorder %s2039_s26, 0 }
  0x33   : > { %s248_s23 = scalar_select %p247_p4, %s1795_s20, 24  ;;  %v1420_v16 = vpack.c.bf16 %v500_v14, %v499_v13  ;;  %v502_v19 = vld [vmem:[%s2033_s2 + $0x38] sm:$0xff]  ;;  %v503_v23 = vld [vmem:[%s2033_s2 + $0x40] sm:$0xff]  ;;  %v504_v24 = vld [vmem:[%s2033_s2 + $0x48] sm:$0xff] }
  0x34   : > { %1413 = vmatprep.subr.bf16.mxu1 %v1412_v10  ;;  %v1424_v21 = vpack.c.bf16 %v502_v19, %v501_v18  ;;  %v1428_v26 = vpack.c.bf16 %v504_v24, %v503_v23  ;;  %v505_v28 = vld [vmem:[%s2033_s2 + $0x50] sm:$0xff]  ;;  %v506_v29 = vld [vmem:[%s2033_s2 + $0x58] sm:$0xff]  ;;  %v507_v33 = vld [vmem:[%s2033_s2 + $0x60] sm:$0xff]  ;;  %s866_s18 = ssub.s32 (%p2045_p6), 25, %s1795_s20  ;;  %s1190_s13 = sshll.u32 (%p2045_p6), %s1743_s21, 7 }
  0x35   : > { %s1153_s24 = sshll.u32 %s248_s23, 3  ;;  %1415 = vmatpush3.bf16.msra.mxu1 %v1412_v10  ;;  %v1432_v31 = vpack.c.bf16 %v506_v29, %v505_v28  ;;  %v508_v34 = vld [vmem:[%s2033_s2 + $0x68] sm:$0xff]  ;;  %v509_v38 = vld [vmem:[%s2033_s2 + $0x70] sm:$0xff]  ;;  %v510_v39 = vld [vmem:[%s2033_s2 + $0x78] sm:$0xff]  ;;  %p867_p7 = scmp.lt.s32.totalorder (%p2045_p6), %s866_s18, 16 }
  0x36   : > { %s1802_s27 = scalar_lea.vmem %s2031_s0, %s1153_s24  ;;  %1417 = vmatprep.subr.bf16.mxu1 %v1416_v11  ;;  %v1436_v36 = vpack.c.bf16 %v508_v34, %v507_v33  ;;  %v1440_v40 = vpack.c.bf16 %v510_v39, %v509_v38  ;;  %v676_v41 = vld [vmem:[#allocation2] sm:$0xff]  ;;  %v677_v42 = vld [vmem:[#allocation2 + $0x8] sm:$0xff]  ;;  %v678_v43 = vld [vmem:[#allocation2 + $0x10] sm:$0xff]  ;;  %s1938_s16 = scalar_lea.vmem (%p2045_p6), %s2036_s5, %s1190_s13  }
  0x37   : > { %v261_v1 = vld [vmem:[%s1802_s27] sm:$0xff]  ;;  %v262_v2 = vld [vmem:[%s1802_s27 + $0x8] sm:$0xff]  ;;  %v263_v3 = vld [vmem:[%s1802_s27 + $0x10] sm:$0xff]  ;;  %v1444_v44 = vpack.c.bf16 %v677_v42, %v676_v41 }
  0x38   : > { %1276 = vmatprep.mubr.msk.f32.mxu0 %vm285_vm0, %v261_v1  ;;  %v264_v4 = vld [vmem:[%s1802_s27 + $0x18] sm:$0xff]  ;;  %v265_v5 = vld [vmem:[%s1802_s27 + $0x20] sm:$0xff]  ;;  %v266_v12 = vld [vmem:[%s1802_s27 + $0x28] sm:$0xff] }
  0x39   : > { %1277 = vmatmul.mubr.msk.f32.vlgmr.msra.gmra.mrb[0].mxu0 %vm285_vm0, %v262_v2  ;;  %v267_v15 = vld [vmem:[%s1802_s27 + $0x30] sm:$0xff]  ;;  %v268_v17 = vld [vmem:[%s1802_s27 + $0x38] sm:$0xff]  ;;  %v269_v20 = vld [vmem:[%s1802_s27 + $0x40] sm:$0xff]  ;;  %1419 = vmatpush3.bf16.msra.mxu1 %v1416_v11 }
  0x3a   : > { %1279 = vmatprep.mubr.msk.f32.mxu0 %vm285_vm0, %v263_v3  ;;  %1421 = vmatprep.subr.bf16.mxu1 %v1420_v16  ;;  %v270_v22 = vld [vmem:[%s1802_s27 + $0x48] sm:$0xff]  ;;  %v271_v25 = vld [vmem:[%s1802_s27 + $0x50] sm:$0xff]  ;;  %v272_v27 = vld [vmem:[%s1802_s27 + $0x58] sm:$0xff] }
  0x3b   : > { %v273_v30 = vld [vmem:[%s1802_s27 + $0x60] sm:$0xff]  ;;  %v274_v32 = vld [vmem:[%s1802_s27 + $0x68] sm:$0xff]  ;;  %v275_v35 = vld [vmem:[%s1802_s27 + $0x70] sm:$0xff]  ;;  %1445 = vmatprep.subr.bf16.mxu0 %v1444_v44 }
  0x3c   : > { %v276_v37 = vld [vmem:[%s1802_s27 + $0x78] sm:$0xff]  ;;  %v680_v47 = vld [vmem:[#allocation2 + $0x20] sm:$0xff]  ;;  %v681_v48 = vld [vmem:[#allocation2 + $0x28] sm:$0xff]  ;;  %1447 = vmatpush3.bf16.msra.mxu0 %v1444_v44 }
  0x3d   : > { %1280 = vmatmul.mubr.msk.f32.gmra.mrb[2].mxu0 %vm285_vm0, %v264_v4  ;;  %1423 = vmatpush3.bf16.msra.mxu1 %v1420_v16  ;;  %v679_v45 = vld [vmem:[#allocation2 + $0x18] sm:$0xff]  ;;  %v1452_v49 = vpack.c.bf16 %v681_v48, %v680_v47  ;;  %v682_v50 = vld [vmem:[#allocation2 + $0x30] sm:$0xff]  ;;  %v684_v53 = vld [vmem:[#allocation2 + $0x40] sm:$0xff] }
  0x3e   : > { %1282 = vmatprep.mubr.msk.f32.mxu0 %vm285_vm0, %v265_v5  ;;  %1425 = vmatprep.subr.bf16.mxu1 %v1424_v21  ;;  %v1448_v46 = vpack.c.bf16 %v679_v45, %v678_v43  ;;  %v683_v51 = vld [vmem:[#allocation2 + $0x38] sm:$0xff]  ;;  %v685_v54 = vld [vmem:[#allocation2 + $0x48] sm:$0xff]  ;;  %v686_v56 = vld [vmem:[#allocation2 + $0x50] sm:$0xff] }
  0x3f   : > { %v1456_v52 = vpack.c.bf16 %v683_v51, %v682_v50  ;;  %v1460_v55 = vpack.c.bf16 %v685_v54, %v684_v53  ;;  %v687_v57 = vld [vmem:[#allocation2 + $0x58] sm:$0xff]  ;;  %v688_v59 = vld [vmem:[#allocation2 + $0x60] sm:$0xff]  ;;  %v689_v60 = vld [vmem:[#allocation2 + $0x68] sm:$0xff] }
  0x40   : > { %1449 = vmatprep.subr.bf16.mxu0 %v1448_v46  ;;  %v1464_v58 = vpack.c.bf16 %v687_v57, %v686_v56  ;;  %v1468_v61 = vpack.c.bf16 %v689_v60, %v688_v59  ;;  %v1154_v62 = vld [vmem:[%s2035_s4] ss:$0 sm:$0xff]  ;;  %v690_v47 = vld [vmem:[#allocation2 + $0x70] sm:$0xff]  ;;  %v691_v48 = vld [vmem:[#allocation2 + $0x78] sm:$0xff] }
  0x41   : > { %1283 = vmatmul.mubr.msk.f32.gmra.mrb[4].mxu0 %vm285_vm0, %v266_v12  ;;  %1427 = vmatpush3.bf16.msra.mxu1 %v1424_v21  ;;  %v1171_v50 = vld [vmem:[%s2035_s4 + $0x1] ss:$0 sm:$0xff] }
  0x42   : > { %1285 = vmatprep.mubr.msk.f32.mxu0 %vm285_vm0, %v267_v15  ;;  %1429 = vmatprep.subr.bf16.mxu1 %v1428_v26 }
  0x43   : > { %1451 = vmatpush3.bf16.msra.mxu0 %v1448_v46 }
  0x44   : > { %1453 = vmatprep.subr.bf16.mxu0 %v1452_v49 }
  0x45   : > { %1286 = vmatmul.mubr.msk.f32.gmra.mrb[6].mxu0 %vm285_vm0, %v268_v17  ;;  %1431 = vmatpush3.bf16.msra.mxu1 %v1428_v26 }
  0x46   : > { %1288 = vmatprep.mubr.msk.f32.mxu0 %vm285_vm0, %v269_v20  ;;  %1433 = vmatprep.subr.bf16.mxu1 %v1432_v31 }
  0x47   : > { %1455 = vmatpush3.bf16.msra.mxu0 %v1452_v49  ;;  %v1472_v49 = vpack.c.bf16 %v691_v48, %v690_v47 }
  0x48   : > { %1457 = vmatprep.subr.bf16.mxu0 %v1456_v52 }
  0x49   : > { %1289 = vmatmul.mubr.msk.f32.gmra.mrb[8].mxu0 %vm285_vm0, %v270_v22  ;;  %1435 = vmatpush3.bf16.msra.mxu1 %v1432_v31 }
  0x4a   : > { %1291 = vmatprep.mubr.msk.f32.mxu0 %vm285_vm0, %v271_v25  ;;  %1437 = vmatprep.subr.bf16.mxu1 %v1436_v36 }
  0x4b   : > { %1459 = vmatpush3.bf16.msra.mxu0 %v1456_v52 }
  0x4c   : > { %1461 = vmatprep.subr.bf16.mxu0 %v1460_v55 }
  0x4d   : > { %1292 = vmatmul.mubr.msk.f32.gmra.mrb[10].mxu0 %vm285_vm0, %v272_v27  ;;  %1439 = vmatpush3.bf16.msra.mxu1 %v1436_v36 }
  0x4e   : > { %1294 = vmatprep.mubr.msk.f32.mxu0 %vm285_vm0, %v273_v30  ;;  %1441 = vmatprep.subr.bf16.mxu1 %v1440_v40 }
  0x4f   : > { %1463 = vmatpush3.bf16.msra.mxu0 %v1460_v55 }
  0x50   : > { %1465 = vmatprep.subr.bf16.mxu0 %v1464_v58 }
  0x51   : > { %1295 = vmatmul.mubr.msk.f32.gmra.mrb[12].mxu0 %vm285_vm0, %v274_v32  ;;  %1443 = vmatpush3.bf16.msra.mxu1 %v1440_v40 }
  0x52   : > { %1297 = vmatprep.mubr.msk.f32.mxu0 %vm285_vm0, %v275_v35 }
  0x53   : > { %1467 = vmatpush3.bf16.msra.mxu0 %v1464_v58 }
  0x54   : > { %1469 = vmatprep.subr.bf16.mxu0 %v1468_v61 }
  0x55   : > { %1298 = vmatmul.mubr.msk.f32.gmra.mrb[14].mxu0 %vm285_vm0, %v276_v37 }
  0x57   : > { %1471 = vmatpush3.bf16.msra.mxu0 %v1468_v61 }
  0x58   : > { %1473 = vmatprep.subr.bf16.mxu0 %v1472_v49 }
  0x5b   : > { %1475 = vmatpush3.bf16.msra.mxu0 %v1472_v49 }
 0x10c   : > { %v1278_v63 = vpop.f32.mrb[0].mxu0 }
 0x10d   : > { %v406_v0 = vadd.f32 %v1278_v63, %v1154_v62  ;;  %v400_v1 = vpop.f32.mrb[1].mxu0 }
 0x10e   : > { %v401_v2 = vadd.f32 %v1154_v62, %v400_v1 }
 0x10f   : > { %v480_v5 = vmax.f32 %v406_v0, 0.0 }
 0x110   : > { %v1281_v3 = vpop.f32.mrb[2].mxu0  ;;  %v479_v4 = vmax.f32 %v401_v2, 0.0 }
 0x111   : > { %v416_v6 = vadd.f32 %v1281_v3, %v1154_v62  ;;  %v410_v7 = vpop.f32.mrb[3].mxu0 }
 0x112   : > { %v411_v8 = vadd.f32 %v1154_v62, %v410_v7  ;;  %1332 = vmatprep.mubr.f32.mxu1 %v479_v4 }
 0x113   : > { %1333 = vmatmul.mubr.f32.vlgmr.msra.gmra.mrb[0].mxu1 %v480_v5  ;;  %v482_v11 = vmax.f32 %v416_v6, 0.0 }
 0x114   : > { %v481_v9 = vmax.f32 %v411_v8, 0.0  ;;  %v1284_v10 = vpop.f32.mrb[4].mxu0 }
 0x115   : > { %v426_v12 = vadd.f32 %v1284_v10, %v1154_v62  ;;  %v420_v13 = vpop.f32.mrb[5].mxu0 }
 0x116   : > { %v421_v14 = vadd.f32 %v1154_v62, %v420_v13  ;;  %1335 = vmatprep.mubr.f32.mxu1 %v481_v9 }
 0x117   : > { %1336 = vmatmul.mubr.f32.gmra.mrb[2].mxu1 %v482_v11  ;;  %v484_v17 = vmax.f32 %v426_v12, 0.0 }
 0x118   : > { %v483_v15 = vmax.f32 %v421_v14, 0.0  ;;  %v1287_v16 = vpop.f32.mrb[6].mxu0 }
 0x119   : > { %v436_v18 = vadd.f32 %v1287_v16, %v1154_v62  ;;  %v430_v19 = vpop.f32.mrb[7].mxu0 }
 0x11a   : > { %v431_v20 = vadd.f32 %v1154_v62, %v430_v19  ;;  %1338 = vmatprep.mubr.f32.mxu1 %v483_v15 }
 0x11b   : > { %1339 = vmatmul.mubr.f32.gmra.mrb[4].mxu1 %v484_v17  ;;  %v486_v23 = vmax.f32 %v436_v18, 0.0 }
 0x11c   : > { %v485_v21 = vmax.f32 %v431_v20, 0.0  ;;  %v1290_v22 = vpop.f32.mrb[8].mxu0 }
 0x11d   : > { %v446_v24 = vadd.f32 %v1290_v22, %v1154_v62  ;;  %v440_v25 = vpop.f32.mrb[9].mxu0 }
 0x11e   : > { %v441_v26 = vadd.f32 %v1154_v62, %v440_v25  ;;  %1341 = vmatprep.mubr.f32.mxu1 %v485_v21 }
 0x11f   : > { %1342 = vmatmul.mubr.f32.gmra.mrb[6].mxu1 %v486_v23  ;;  %v488_v29 = vmax.f32 %v446_v24, 0.0 }
 0x120   : > { %v487_v27 = vmax.f32 %v441_v26, 0.0  ;;  %v1293_v28 = vpop.f32.mrb[10].mxu0 }
 0x121   : > { %v456_v30 = vadd.f32 %v1293_v28, %v1154_v62  ;;  %v450_v31 = vpop.f32.mrb[11].mxu0 }
 0x122   : > { %v451_v32 = vadd.f32 %v1154_v62, %v450_v31  ;;  %1344 = vmatprep.mubr.f32.mxu1 %v487_v27 }
 0x123   : > { %1345 = vmatmul.mubr.f32.gmra.mrb[8].mxu1 %v488_v29  ;;  %v490_v35 = vmax.f32 %v456_v30, 0.0 }
 0x124   : > { %v489_v33 = vmax.f32 %v451_v32, 0.0  ;;  %v1296_v34 = vpop.f32.mrb[12].mxu0 }
 0x125   : > { %v466_v36 = vadd.f32 %v1296_v34, %v1154_v62  ;;  %v460_v37 = vpop.f32.mrb[13].mxu0 }
 0x126   : > { %v461_v38 = vadd.f32 %v1154_v62, %v460_v37  ;;  %1347 = vmatprep.mubr.f32.mxu1 %v489_v33 }
 0x127   : > { %1348 = vmatmul.mubr.f32.gmra.mrb[10].mxu1 %v490_v35  ;;  %v492_v41 = vmax.f32 %v466_v36, 0.0  ;;  %v1172_v35 = vld [vmem:[%s2035_s4 + $0x2] ss:$0 sm:$0xff] }
 0x128   : > { %v491_v39 = vmax.f32 %v461_v38, 0.0  ;;  %v1299_v40 = vpop.f32.mrb[14].mxu0 }
 0x129   : > { %v476_v42 = vadd.f32 %v1299_v40, %v1154_v62  ;;  %v470_v43 = vpop.f32.mrb[15].mxu0 }
 0x12a   : > { %v471_v44 = vadd.f32 %v1154_v62, %v470_v43  ;;  %1350 = vmatprep.mubr.f32.mxu1 %v491_v39 }
 0x12b   : > { %1351 = vmatmul.mubr.f32.gmra.mrb[12].mxu1 %v492_v41  ;;  %v494_v46 = vmax.f32 %v476_v42, 0.0 }
 0x12c   : > { %v493_v45 = vmax.f32 %v471_v44, 0.0 }
 0x12e   : > { %1353 = vmatprep.mubr.f32.mxu1 %v493_v45 }
 0x12f   : > { %1354 = vmatmul.mubr.f32.gmra.mrb[14].mxu1 %v494_v46 }
 0x1e6   : > { %v1334_v51 = vpop.f32.mrb[0].mxu1 }
 0x1e7   : > { %v587_v52 = vadd.f32 %v1334_v51, %v1171_v50  ;;  %v581_v53 = vpop.f32.mrb[1].mxu1 }
 0x1e8   : > { %v582_v54 = vadd.f32 %v1171_v50, %v581_v53 }
 0x1e9   : > { %v661_v57 = vmax.f32 %v587_v52, 0.0 }
 0x1ea   : > { %v660_v55 = vmax.f32 %v582_v54, 0.0  ;;  %v1337_v56 = vpop.f32.mrb[2].mxu1 }
 0x1eb   : > { %v597_v58 = vadd.f32 %v1337_v56, %v1171_v50  ;;  %v591_v59 = vpop.f32.mrb[3].mxu1 }
 0x1ec   : > { %v592_v60 = vadd.f32 %v1171_v50, %v591_v59  ;;  %1388 = vmatprep.mubr.f32.mxu0 %v660_v55 }
 0x1ed   : > { %1389 = vmatmul.mubr.f32.vlgmr.msra.gmra.mrb[16].mxu0 %v661_v57  ;;  %v663_v63 = vmax.f32 %v597_v58, 0.0 }
 0x1ee   : > { %v662_v61 = vmax.f32 %v592_v60, 0.0  ;;  %v1340_v62 = vpop.f32.mrb[4].mxu1 }
 0x1ef   : > { %v607_v0 = vadd.f32 %v1340_v62, %v1171_v50  ;;  %v601_v1 = vpop.f32.mrb[5].mxu1 }
 0x1f0   : > { %v602_v2 = vadd.f32 %v1171_v50, %v601_v1  ;;  %1391 = vmatprep.mubr.f32.mxu0 %v662_v61 }
 0x1f1   : > { %1392 = vmatmul.mubr.f32.gmra.mrb[18].mxu0 %v663_v63  ;;  %v665_v5 = vmax.f32 %v607_v0, 0.0 }
 0x1f2   : > { %v664_v3 = vmax.f32 %v602_v2, 0.0  ;;  %v1343_v4 = vpop.f32.mrb[6].mxu1 }
 0x1f3   : > { %v617_v6 = vadd.f32 %v1343_v4, %v1171_v50  ;;  %v611_v7 = vpop.f32.mrb[7].mxu1 }
 0x1f4   : > { %v612_v8 = vadd.f32 %v1171_v50, %v611_v7  ;;  %1394 = vmatprep.mubr.f32.mxu0 %v664_v3 }
 0x1f5   : > { %1395 = vmatmul.mubr.f32.gmra.mrb[20].mxu0 %v665_v5  ;;  %v667_v11 = vmax.f32 %v617_v6, 0.0 }
 0x1f6   : > { %v666_v9 = vmax.f32 %v612_v8, 0.0  ;;  %v1346_v10 = vpop.f32.mrb[8].mxu1 }
 0x1f7   : > { %v627_v12 = vadd.f32 %v1346_v10, %v1171_v50  ;;  %v621_v13 = vpop.f32.mrb[9].mxu1 }
 0x1f8   : > { %v622_v14 = vadd.f32 %v1171_v50, %v621_v13  ;;  %1397 = vmatprep.mubr.f32.mxu0 %v666_v9 }
 0x1f9   : > { %1398 = vmatmul.mubr.f32.gmra.mrb[22].mxu0 %v667_v11  ;;  %v669_v17 = vmax.f32 %v627_v12, 0.0 }
 0x1fa   : > { %v668_v15 = vmax.f32 %v622_v14, 0.0  ;;  %v1349_v16 = vpop.f32.mrb[10].mxu1 }
 0x1fb   : > { %v637_v18 = vadd.f32 %v1349_v16, %v1171_v50  ;;  %v631_v19 = vpop.f32.mrb[11].mxu1 }
 0x1fc   : > { %v632_v20 = vadd.f32 %v1171_v50, %v631_v19  ;;  %1400 = vmatprep.mubr.f32.mxu0 %v668_v15 }
 0x1fd   : > { %1401 = vmatmul.mubr.f32.gmra.mrb[24].mxu0 %v669_v17  ;;  %v671_v23 = vmax.f32 %v637_v18, 0.0 }
 0x1fe   : > { %v670_v21 = vmax.f32 %v632_v20, 0.0  ;;  %v1352_v22 = vpop.f32.mrb[12].mxu1 }
 0x1ff   : > { %v647_v24 = vadd.f32 %v1352_v22, %v1171_v50  ;;  %v641_v25 = vpop.f32.mrb[13].mxu1 }
 0x200   : > { %v642_v26 = vadd.f32 %v1171_v50, %v641_v25  ;;  %1403 = vmatprep.mubr.f32.mxu0 %v670_v21 }
 0x201   : > { %1404 = vmatmul.mubr.f32.gmra.mrb[26].mxu0 %v671_v23  ;;  %v673_v29 = vmax.f32 %v647_v24, 0.0 }
 0x202   : > { %v672_v27 = vmax.f32 %v642_v26, 0.0  ;;  %v1355_v28 = vpop.f32.mrb[14].mxu1 }
 0x203   : > { %v657_v30 = vadd.f32 %v1355_v28, %v1171_v50  ;;  %v651_v31 = vpop.f32.mrb[15].mxu1 }
 0x204   : > { %v652_v32 = vadd.f32 %v1171_v50, %v651_v31  ;;  %1406 = vmatprep.mubr.f32.mxu0 %v672_v27 }
 0x205   : > { %1407 = vmatmul.mubr.f32.gmra.mrb[28].mxu0 %v673_v29  ;;  %v675_v34 = vmax.f32 %v657_v30, 0.0 }
 0x206   : > { %v674_v33 = vmax.f32 %v652_v32, 0.0 }
 0x208   : > { %1409 = vmatprep.mubr.f32.mxu0 %v674_v33 }
 0x209   : > { %1410 = vmatmul.mubr.f32.gmra.mrb[30].mxu0 %v675_v34 }
 0x2c0   : > { %v1390_v36 = vpop.f32.mrb[16].mxu0 }
 0x2c1   : > { %v768_v37 = vadd.f32 %v1390_v36, %v1172_v35  ;;  %v762_v38 = vpop.f32.mrb[17].mxu0 }
 0x2c2   : > { %v763_v39 = vadd.f32 %v1172_v35, %v762_v38 }
 0x2c3   : > { %843 = vst.msk [vmem:[%s1897_s12 + $0x8] sm:$0xff] %vm841_vm1, %v768_v37 }
 0x2c4   : > { %842 = vst.msk [vmem:[%s1897_s12] sm:$0xff] %vm841_vm1, %v763_v39  ;;  %v1393_v40 = vpop.f32.mrb[18].mxu0 }
 0x2c5   : > { %v778_v41 = vadd.f32 %v1393_v40, %v1172_v35  ;;  %v772_v42 = vpop.f32.mrb[19].mxu0 }
 0x2c6   : > { %v773_v43 = vadd.f32 %v1172_v35, %v772_v42 }
 0x2c7   : > { %845 = vst.msk [vmem:[%s1897_s12 + $0x18] sm:$0xff] %vm841_vm1, %v778_v41 }
 0x2c8   : > { %844 = vst.msk [vmem:[%s1897_s12 + $0x10] sm:$0xff] %vm841_vm1, %v773_v43  ;;  %v1396_v44 = vpop.f32.mrb[20].mxu0 }
 0x2c9   : > { %v788_v45 = vadd.f32 %v1396_v44, %v1172_v35  ;;  %v782_v46 = vpop.f32.mrb[21].mxu0 }
 0x2ca   : > { %v783_v47 = vadd.f32 %v1172_v35, %v782_v46 }
 0x2cb   : > { %847 = vst.msk [vmem:[%s1897_s12 + $0x28] sm:$0xff] %vm841_vm1, %v788_v45 }
 0x2cc   : > { %846 = vst.msk [vmem:[%s1897_s12 + $0x20] sm:$0xff] %vm841_vm1, %v783_v47  ;;  %v1399_v48 = vpop.f32.mrb[22].mxu0 }
 0x2cd   : > { %v798_v49 = vadd.f32 %v1399_v48, %v1172_v35  ;;  %v792_v50 = vpop.f32.mrb[23].mxu0 }
 0x2ce   : > { %v793_v51 = vadd.f32 %v1172_v35, %v792_v50 }
 0x2cf   : > { %849 = vst.msk [vmem:[%s1897_s12 + $0x38] sm:$0xff] %vm841_vm1, %v798_v49 }
 0x2d0   : > { %848 = vst.msk [vmem:[%s1897_s12 + $0x30] sm:$0xff] %vm841_vm1, %v793_v51  ;;  %v1402_v52 = vpop.f32.mrb[24].mxu0 }
 0x2d1   : > { %v808_v53 = vadd.f32 %v1402_v52, %v1172_v35  ;;  %v802_v54 = vpop.f32.mrb[25].mxu0 }
 0x2d2   : > { %v803_v55 = vadd.f32 %v1172_v35, %v802_v54 }
 0x2d3   : > { %851 = vst.msk [vmem:[%s1897_s12 + $0x48] sm:$0xff] %vm841_vm1, %v808_v53 }
 0x2d4   : > { %850 = vst.msk [vmem:[%s1897_s12 + $0x40] sm:$0xff] %vm841_vm1, %v803_v55  ;;  %v1405_v56 = vpop.f32.mrb[26].mxu0 }
 0x2d5   : > { %v818_v57 = vadd.f32 %v1405_v56, %v1172_v35  ;;  %v812_v58 = vpop.f32.mrb[27].mxu0 }
 0x2d6   : > { %v813_v59 = vadd.f32 %v1172_v35, %v812_v58 }
 0x2d7   : > { %853 = vst.msk [vmem:[%s1897_s12 + $0x58] sm:$0xff] %vm841_vm1, %v818_v57 }
 0x2d8   : > { %852 = vst.msk [vmem:[%s1897_s12 + $0x50] sm:$0xff] %vm841_vm1, %v813_v59  ;;  %v1408_v60 = vpop.f32.mrb[28].mxu0 }
 0x2d9   : > { %v828_v61 = vadd.f32 %v1408_v60, %v1172_v35  ;;  %v822_v62 = vpop.f32.mrb[29].mxu0 }
 0x2da   : > { %v823_v63 = vadd.f32 %v1172_v35, %v822_v62  ;;  %864 = sbr.rel (!%p2045_p6) target bundleno = 786 (0x312), region = 48 }
 0x2db   : > { %855 = vst.msk [vmem:[%s1897_s12 + $0x68] sm:$0xff] %vm841_vm1, %v828_v61 }
 0x2dc   : > { %854 = vst.msk [vmem:[%s1897_s12 + $0x60] sm:$0xff] %vm841_vm1, %v823_v63  ;;  %v1411_v0 = vpop.f32.mrb[30].mxu0 }
 0x2dd   : > { %v838_v1 = vadd.f32 %v1411_v0, %v1172_v35  ;;  %v832_v2 = vpop.f32.mrb[31].mxu0 }
 0x2de   : > { %v833_v3 = vadd.f32 %v1172_v35, %v832_v2 }
 0x2df   : > { %857 = vst.msk [vmem:[%s1897_s12 + $0x78] sm:$0xff] %vm841_vm1, %v838_v1 }
 0x2e0   : > { %856 = vst.msk [vmem:[%s1897_s12 + $0x70] sm:$0xff] %vm841_vm1, %v833_v3 }
 0x2e1   : > { %s2053_s18 = smov (!%p867_p7, %s866_s18), 16 }
 0x2e2   : > { %s1175_s17 = sshll.u32 %s2053_s18, 7 }
 0x2e3   : > { %p1178_p9 = scmp.eq.s32.totalorder %s1175_s17, 0 }
 0x2e4   : > { %s1944_s23 = sshrl.u32 (!%p1178_p9), %s2053_s18, 4 }
 0x2e5   : > { %875 = sbr.rel (%p1178_p9) target bundleno = 786 (0x312), region = 52  ;;  %p1179_p13 = scmp.le.s32.totalorder (!%p1178_p9), %s1944_s23, 0 }
 0x2ec   : > { %1092 = sbr.rel (%p1179_p13) target bundleno = 765 (0x2fd), region = 129  ;;  %s2046_s21 = smov (!%p1179_p13), %s1938_s16 }
 0x2ed   : > { %s2047_s26 = smov (!%p1179_p13), %s1897_s12  ;;  %s1953_s20 = smov (!%p1179_p13), 0  }
 0x2ee   : > { %s1955_s24 = smov (!%p1179_p13), 0  }
 0x2f3 LB: >> { %v967_v4 = vld [vmem:[%s1671_s26] sm:$0xff]  ;;  %v969_v5 = vld [vmem:[%s1671_s26 + $0x8] sm:$0xff]  ;;  %v971_v6 = vld [vmem:[%s1671_s26 + $0x10] sm:$0xff]  ;;  %s999_s28 = sadd.s32 1, %s1675_s20  ;;  %s961_s24 = sadd.s32 1, %s1679_s24   ;;  %s1679_s24 = sphi %s1955_s24, %s961_s24   ;;  %s1675_s20 = sphi %s1953_s20, %s2048_s20   ;;  %s1671_s26 = sphi %s2047_s26, %s1004_s26   ;;  %s1667_s21 = sphi %s2046_s21, %s1005_s21  }
 0x2f4   : >> { %968 = vst [vmem:[%s1667_s21] sm:$0xff] %v967_v4  ;;  %970 = vst [vmem:[%s1667_s21 + $0x8] sm:$0xff] %v969_v5  ;;  %v973_v7 = vld [vmem:[%s1671_s26 + $0x18] sm:$0xff]  ;;  %v975_v8 = vld [vmem:[%s1671_s26 + $0x20] sm:$0xff]  ;;  %p1000_p0 = scmp.ge.s32.totalorder %s999_s28, %s1944_s23  ;;  %p960_p1 = scmp.ge.s32.totalorder %s961_s24, %s1944_s23 }
 0x2f5   : >> { %972 = vst [vmem:[%s1667_s21 + $0x10] sm:$0xff] %v971_v6  ;;  %v977_v9 = vld [vmem:[%s1671_s26 + $0x28] sm:$0xff]  ;;  %974 = vst [vmem:[%s1667_s21 + $0x18] sm:$0xff] %v973_v7  ;;  %v979_v10 = vld [vmem:[%s1671_s26 + $0x30] sm:$0xff] }
 0x2f6   : >> { %976 = vst [vmem:[%s1667_s21 + $0x20] sm:$0xff] %v975_v8  ;;  %978 = vst [vmem:[%s1667_s21 + $0x28] sm:$0xff] %v977_v9  ;;  %v981_v11 = vld [vmem:[%s1671_s26 + $0x38] sm:$0xff]  ;;  %v983_v12 = vld [vmem:[%s1671_s26 + $0x40] sm:$0xff]  ;;  %s2055_s28 = smov (%p1000_p0, %s999_s28), 0  ;;  %963 = sbr.rel (!%p960_p1) target bundleno = 755 (0x2f3), region = 135 }
 0x2f7   : >> { %980 = vst [vmem:[%s1667_s21 + $0x30] sm:$0xff] %v979_v10  ;;  %982 = vst [vmem:[%s1667_s21 + $0x38] sm:$0xff] %v981_v11  ;;  %v985_v13 = vld [vmem:[%s1671_s26 + $0x48] sm:$0xff]  ;;  %v987_v14 = vld [vmem:[%s1671_s26 + $0x50] sm:$0xff]  ;;  %s1180_s29 = sshll.u32 %s2055_s28, 7  ;;  %s2048_s20 = smov %s2055_s28 }
 0x2f8   : >> { %984 = vst [vmem:[%s1667_s21 + $0x40] sm:$0xff] %v983_v12  ;;  %v989_v15 = vld [vmem:[%s1671_s26 + $0x58] sm:$0xff]  ;;  %986 = vst [vmem:[%s1667_s21 + $0x48] sm:$0xff] %v985_v13  ;;  %v991_v16 = vld [vmem:[%s1671_s26 + $0x60] sm:$0xff] }
 0x2f9   : >> { %988 = vst [vmem:[%s1667_s21 + $0x50] sm:$0xff] %v987_v14  ;;  %990 = vst [vmem:[%s1667_s21 + $0x58] sm:$0xff] %v989_v15  ;;  %v993_v17 = vld [vmem:[%s1671_s26 + $0x68] sm:$0xff]  ;;  %v995_v18 = vld [vmem:[%s1671_s26 + $0x70] sm:$0xff] }
 0x2fa   : >> { %992 = vst [vmem:[%s1667_s21 + $0x60] sm:$0xff] %v991_v16  ;;  %994 = vst [vmem:[%s1667_s21 + $0x68] sm:$0xff] %v993_v17  ;;  %v997_v19 = vld [vmem:[%s1671_s26 + $0x78] sm:$0xff]  ;;  %s1004_s26 = scalar_lea.vmem %s1897_s12, %s1180_s29 [#allocation4]  }
 0x2fb   : >> { %996 = vst [vmem:[%s1667_s21 + $0x70] sm:$0xff] %v995_v18  ;;  %998 = vst [vmem:[%s1667_s21 + $0x78] sm:$0xff] %v997_v19  ;;  %s1005_s21 = scalar_lea.vmem %s1938_s16, %s1180_s29  }
 0x2fd PF: > { %s2013_s27 = sand.u32 15, %s2053_s18   ;;  %s1191_s30 = sshll.u32 %s1944_s23, 7 }
 0x2fe   : > { %s1010_s6 = scalar_lea.vmem %s1897_s12, %s1191_s30 [#allocation4]   ;;  %s1012_s7 = scalar_lea.vmem %s1938_s16, %s1191_s30  }
 0x2ff   : > { %p1185_p2 = scmp.le.s32.totalorder %s2013_s27, 0 }
 0x300   : > { %s1681_s8 = smov (!%p1185_p2), %s1012_s7   ;;  %s1685_s9 = smov (!%p1185_p2), %s1010_s6  }
 0x301   : > { %1106 = sbr.rel (%p1185_p2) target bundleno = 786 (0x312), region = 140  ;;  %s1689_s10 = smov (!%p1185_p2), 0  }
 0x302   : > { %s1693_s11 = smov (!%p1185_p2), 0  }
 0x308 LB: >> { %v1022_v20 = vld [vmem:[%s1687_s9] sm:$0xff]  ;;  %s1024_s18 = sadd.s32 1, %s1691_s10  ;;  %s1016_s11 = sadd.s32 1, %s1695_s11   ;;  %s1695_s11 = sphi %s1693_s11, %s1016_s11   ;;  %s1691_s10 = sphi %s1689_s10, %s1690_s10   ;;  %s1687_s9 = sphi %s1685_s9, %s1029_s9   ;;  %s1683_s8 = sphi %s1681_s8, %s1030_s8  }
 0x309   : >> { %1023 = vst [vmem:[%s1683_s8] sm:$0xff] %v1022_v20  ;;  %p1025_p3 = scmp.ge.s32.totalorder %s1024_s18, %s2013_s27  ;;  %p1015_p5 = scmp.ge.s32.totalorder %s1016_s11, %s2013_s27 }
 0x30b   : >> { %s2057_s18 = smov (%p1025_p3, %s1024_s18), 0  ;;  %1018 = sbr.rel (!%p1015_p5) target bundleno = 776 (0x308), region = 146 }
 0x30c   : >> { %s1186_s12 = sshll.u32 %s2057_s18, 3  ;;  %s1690_s10 = smov %s2057_s18  }
 0x30d   : >> { %s1029_s9 = scalar_lea.vmem %s1010_s6, %s1186_s12 [#allocation4]   ;;  %s1030_s8 = scalar_lea.vmem %s1012_s7, %s1186_s12  }
 0x312 PF: > { %p13_p8 = scmp.ge.s32.totalorder %s1745_s22, 4   ;;  %s2049_s18 = smov %s1659_s19 }
 0x313   : > { %s2050_s19 = smov %s1753_s25  ;;  %s2051_s20 = smov %s1745_s22 }
 0x314   :  { %15 = sbr.rel (!%p13_p8) target bundleno = 2 (0x2), region = 157 }
 0x31b   :  { %1046 = vsyncpa [#allocation3], 1 }
 0x31c   :  { %1048 = vsyncpa [#allocation3 + $0x1], 1 }

</bundles_post_ra>
